<compile_context>
chip_gen: v6e
topology: v6e:2x2x1
jax: 0.10.0
libtpu: 0.0.40
codegen_flags: <defaults>
</compile_context>

<pallas_src>
import functools

import jax
import jax.numpy as jnp
from jax import lax
from jax.experimental import pallas as pl
from jax.experimental.pallas import tpu as pltpu

INPUT_DIM = 7
INPUT_DIM_PAD = 8          # sublane-aligned K for the hoisted input matmul
HIDDEN_DIM = 32
OUTPUT_DIM = 1


def lstm_kernel(x_ref, w_ih_ref, w_hh_ref, b_ref, w_lin_ref, b_lin_ref,
                out_ref, gates_in_ref, h_hist_ref, *, seq_len):
    """Whole (padded) sequence handled in one kernel invocation.

    x_ref       : (seq_pad, 8)            VMEM  (zero-padded input)
    w_ih_ref    : (8, 4*H)                VMEM  (= W_ih^T, i/f/o cols * 0.5)
    w_hh_ref    : (H, 4*H)                VMEM  (= W_hh^T, i/f/o cols * 0.5)
    b_ref       : (1, 4*H)                VMEM  (= b_ih + b_hh, i/f/o * 0.5)
    w_lin_ref   : (H, OUTPUT_DIM)         VMEM  (= W_lin^T)
    b_lin_ref   : (1, OUTPUT_DIM)         VMEM
    out_ref     : (seq_pad, OUTPUT_DIM)   VMEM
    gates_in_ref: (seq_pad, 4*H)          VMEM scratch (hoisted x-projection)
    h_hist_ref  : (seq_pad, H)            VMEM scratch (per-step hidden states)
    """
    H = HIDDEN_DIM

    # ---- Hoisted input projection: one MXU matmul for the whole sequence,
    #      bias folded in.  Off the serial per-step critical path.
    gates_in_ref[...] = (
        jnp.dot(x_ref[...], w_ih_ref[...], preferred_element_type=jnp.float32)
        + b_ref[...])

    # Deterministic padded tail rows for the post-loop Linear (one cheap bulk
    # store, off the serial path; padded output rows are discarded anyway).
    h_hist_ref[...] = jnp.zeros_like(h_hist_ref)

    # Hoist the recurrent weight load; regalloc keeps it live across steps.
    # TODO(synk): optionally latch W_hh in the MXU staging registers via
    # pltpu.matmul_push_rhs / matmul_acc_lhs / matmul_pop; kept as jnp.dot
    # for portability across v5e/v6e/v7x.
    w_hh = w_hh_ref[...]

    def step(t, carry):
        h, c = carry                               # (1,H) vreg-resident state
        # Only the recurrent matmul + one big EUP push remain on the chain.
        gates = gates_in_ref[pl.ds(t, 1), :] + jnp.dot(
            h, w_hh, preferred_element_type=jnp.float32)

        # Single 128-lane EUP push.  i/f/o lanes hold x/2 (weights pre-scaled
        # in the wrapper), so sigmoid(x) = 0.5*tanh(x/2) + 0.5 via the VPU;
        # the g lanes carry the plain tanh.
        t_all = jnp.tanh(gates)
        i = 0.5 * t_all[:, 0 * H:1 * H] + 0.5
        f = 0.5 * t_all[:, 1 * H:2 * H] + 0.5
        g = t_all[:, 2 * H:3 * H]
        o = 0.5 * t_all[:, 3 * H:4 * H] + 0.5

        c_new = f * c + i * g
        h_new = o * jnp.tanh(c_new)                # unavoidable 32-lane push
        h_hist_ref[pl.ds(t, 1), :] = h_new         # single vst per step
        return h_new, c_new

    h0 = jnp.zeros((1, H), jnp.float32)            # nn.LSTM default zero state
    c0 = jnp.zeros((1, H), jnp.float32)
    unroll = True if seq_len <= 128 else 8
    lax.fori_loop(0, seq_len, step, (h0, c0), unroll=unroll)

    # ---- Post-loop fused Linear(hidden_dim -> output_dim): one matmul,
    #      one bulk store (no per-step 1-lane masked stores).
    out_ref[...] = (
        jnp.dot(h_hist_ref[...], w_lin_ref[...],
                preferred_element_type=jnp.float32)
        + b_lin_ref[...])


def lstm_forward(x, params):
    """x: (seq_len, INPUT_DIM) float32 -> predictions: (seq_len, OUTPUT_DIM)."""
    seq_len = int(x.shape[0])
    seq_pad = max(8, ((seq_len + 7) // 8) * 8)     # sublane-align the sequence
    H = HIDDEN_DIM

    # Zero-pad the input feature dim 7 -> 8 and the sequence to a multiple of 8.
    x_pad = jnp.zeros((seq_pad, INPUT_DIM_PAD), jnp.float32)
    x_pad = x_pad.at[:seq_len, :INPUT_DIM].set(x.astype(jnp.float32))

    # Gate-column scale: i/f/o columns * 0.5 for the sigmoid-from-tanh
    # identity (exact in f32 — scaling by a power of two), g columns * 1.
    gate_scale = jnp.concatenate(
        [jnp.full((H,), 0.5, jnp.float32),
         jnp.full((H,), 0.5, jnp.float32),
         jnp.ones((H,), jnp.float32),
         jnp.full((H,), 0.5, jnp.float32)]).reshape(1, 4 * H)

    # Pre-transpose / pre-pad weights so in-kernel matmuls put the 4*H gate
    # axis (= 128 lanes exactly) on the lane dimension.
    w_ih_t = jnp.zeros((INPUT_DIM_PAD, 4 * H), jnp.float32)
    w_ih_t = w_ih_t.at[:INPUT_DIM, :].set(params["w_ih"].T)     # (8, 128)
    w_ih_t = w_ih_t * gate_scale
    w_hh_t = params["w_hh"].T * gate_scale                      # (32, 128)
    b = ((params["b_ih"] + params["b_hh"]).reshape(1, -1)
         * gate_scale)                                          # (1, 128)
    w_lin_t = params["w_lin"].T                                 # (32, 1)
    b_lin = params["b_lin"].reshape(1, OUTPUT_DIM)              # (1, 1)

    cost = pl.CostEstimate(
        flops=seq_pad * 2 * INPUT_DIM_PAD * 4 * H
        + seq_len * 2 * H * 4 * H
        + seq_pad * 2 * H * OUTPUT_DIM,
        transcendentals=seq_len * (4 * H + H),
        bytes_accessed=4 * (seq_pad * (INPUT_DIM_PAD + OUTPUT_DIM)
                            + INPUT_DIM_PAD * 4 * H
                            + H * 4 * H
                            + 4 * H
                            + H * OUTPUT_DIM + OUTPUT_DIM),
    )

    kernel = functools.partial(lstm_kernel, seq_len=seq_len)

    out = pl.pallas_call(
        kernel,
        out_shape=jax.ShapeDtypeStruct((seq_pad, OUTPUT_DIM), jnp.float32),
        in_specs=[pl.BlockSpec(memory_space=pltpu.MemorySpace.VMEM)] * 6,
        out_specs=pl.BlockSpec(memory_space=pltpu.MemorySpace.VMEM),
        scratch_shapes=[
            pltpu.VMEM((seq_pad, 4 * H), jnp.float32),   # gates_in
            pltpu.VMEM((seq_pad, H), jnp.float32),       # h history
        ],
        cost_estimate=cost,
    )(x_pad, w_ih_t, w_hh_t, b, w_lin_t, b_lin)

    return out[:seq_len]


def init_params(key):
    """Deterministic init mirroring PyTorch shapes (uniform ±1/sqrt(H))."""
    ks = jax.random.split(key, 6)
    k_lstm = 1.0 / jnp.sqrt(HIDDEN_DIM)
    k_lin = 1.0 / jnp.sqrt(HIDDEN_DIM)
    return {
        "w_ih": jax.random.uniform(ks[0], (4 * HIDDEN_DIM, INPUT_DIM),
                                   jnp.float32, -k_lstm, k_lstm),
        "w_hh": jax.random.uniform(ks[1], (4 * HIDDEN_DIM, HIDDEN_DIM),
                                   jnp.float32, -k_lstm, k_lstm),
        "b_ih": jax.random.uniform(ks[2], (4 * HIDDEN_DIM,),
                                   jnp.float32, -k_lstm, k_lstm),
        "b_hh": jax.random.uniform(ks[3], (4 * HIDDEN_DIM,),
                                   jnp.float32, -k_lstm, k_lstm),
        "w_lin": jax.random.uniform(ks[4], (OUTPUT_DIM, HIDDEN_DIM),
                                    jnp.float32, -k_lin, k_lin),
        "b_lin": jax.random.uniform(ks[5], (OUTPUT_DIM,),
                                    jnp.float32, -k_lin, k_lin),
    }


def reference_forward(x, params):
    """Pure-JAX reference of the PyTorch forward pass (for sanity check)."""
    H = HIDDEN_DIM

    def step(carry, x_t):
        h, c = carry
        gates = (x_t @ params["w_ih"].T + h @ params["w_hh"].T
                 + params["b_ih"] + params["b_hh"])
        i = jax.nn.sigmoid(gates[0 * H:1 * H])
        f = jax.nn.sigmoid(gates[1 * H:2 * H])
        g = jnp.tanh(gates[2 * H:3 * H])
        o = jax.nn.sigmoid(gates[3 * H:4 * H])
        c = f * c + i * g
        h = o * jnp.tanh(c)
        return (h, c), h

    (_, _), hs = lax.scan(step, (jnp.zeros(H), jnp.zeros(H)), x)
    return hs @ params["w_lin"].T + params["b_lin"]


if __name__ == "__main__":
    key = jax.random.PRNGKey(0)
    k_param, k_x = jax.random.split(key)
    params = init_params(k_param)

    seq_len = 8
    x = jax.random.normal(k_x, (seq_len, INPUT_DIM), jnp.float32)

    preds = lstm_forward(x, params)
    preds = jax.block_until_ready(preds)

    ref = reference_forward(x, params)
    assert preds.shape == (seq_len, OUTPUT_DIM)
    assert jnp.allclose(preds, ref, atol=1e-5, rtol=1e-5)

    print("KERNEL_OK")
</pallas_src>

<mosaic_0001>
module attributes {stable_mosaic.version = 11 : i64} {
  func.func @lstm_kernel(%arg0: memref<8x8xf32, #tpu.memory_space<vmem>>, %arg1: memref<8x128xf32, #tpu.memory_space<vmem>>, %arg2: memref<32x128xf32, #tpu.memory_space<vmem>>, %arg3: memref<1x128xf32, #tpu.memory_space<vmem>>, %arg4: memref<32x1xf32, #tpu.memory_space<vmem>>, %arg5: memref<1x1xf32, #tpu.memory_space<vmem>>, %arg6: memref<8x1xf32, #tpu.memory_space<vmem>>, %arg7: memref<8x128xf32, #tpu.memory_space<vmem>>, %arg8: memref<8x32xf32, #tpu.memory_space<vmem>>) attributes {dimension_semantics = [], scalar_prefetch = 0 : i64, scratch_operands = 2 : i64, tpu.core_type = #tpu.core_type<tc>} {
    %c0 = arith.constant 0 : index
    %c0_0 = arith.constant 0 : index
    %0 = vector.load %arg0[%c0, %c0_0] : memref<8x8xf32, #tpu.memory_space<vmem>>, vector<8x8xf32>
    %c0_1 = arith.constant 0 : index
    %c0_2 = arith.constant 0 : index
    %1 = vector.load %arg1[%c0_1, %c0_2] : memref<8x128xf32, #tpu.memory_space<vmem>>, vector<8x128xf32>
    %cst = arith.constant dense<0.000000e+00> : vector<8x128xf32>
    %2 = tpu.matmul %0, %1, %cst {dimension_numbers = #tpu.dot_dimension_numbers<[1], [0], [0], [1], [0, 0, 1, 1], [], []>} : vector<8x8xf32>, vector<8x128xf32>, vector<8x128xf32> -> vector<8x128xf32>
    %c0_3 = arith.constant 0 : index
    %c0_4 = arith.constant 0 : index
    %3 = vector.load %arg3[%c0_3, %c0_4] : memref<1x128xf32, #tpu.memory_space<vmem>>, vector<1x128xf32>
    %4 = vector.broadcast %3 : vector<1x128xf32> to vector<8x128xf32>
    %5 = arith.addf %2, %4 : vector<8x128xf32>
    %c0_5 = arith.constant 0 : index
    %c0_6 = arith.constant 0 : index
    %6 = vector.load %arg7[%c0_5, %c0_6] : memref<8x128xf32, #tpu.memory_space<vmem>>, vector<8x128xf32>
    tpu.vector_store %arg7[%c0_5, %c0_6], %5 {strides = array<i32>} : memref<8x128xf32, #tpu.memory_space<vmem>>, vector<8x128xf32>,
    %cst_7 = arith.constant 0.000000e+00 : f32
    %7 = vector.broadcast %cst_7 : f32 to vector<8x32xf32>
    %c0_8 = arith.constant 0 : index
    %c0_9 = arith.constant 0 : index
    %8 = vector.load %arg8[%c0_8, %c0_9] : memref<8x32xf32, #tpu.memory_space<vmem>>, vector<8x32xf32>
    tpu.vector_store %arg8[%c0_8, %c0_9], %7 {strides = array<i32>} : memref<8x32xf32, #tpu.memory_space<vmem>>, vector<8x32xf32>,
    %c0_10 = arith.constant 0 : index
    %c0_11 = arith.constant 0 : index
    %9 = vector.load %arg2[%c0_10, %c0_11] : memref<32x128xf32, #tpu.memory_space<vmem>>, vector<32x128xf32>
    %cst_12 = arith.constant 0.000000e+00 : f32
    %10 = vector.broadcast %cst_12 : f32 to vector<1x32xf32>
    %cst_13 = arith.constant 0.000000e+00 : f32
    %11 = vector.broadcast %cst_13 : f32 to vector<1x32xf32>
    %c0_i32 = arith.constant 0 : i32
    %12 = arith.index_cast %c0_i32 : i32 to index
    %c0_14 = arith.constant 0 : index
    %13 = vector.load %arg7[%12, %c0_14] : memref<8x128xf32, #tpu.memory_space<vmem>>, vector<1x128xf32>
    %cst_15 = arith.constant dense<0.000000e+00> : vector<1x128xf32>
    %14 = tpu.matmul %10, %9, %cst_15 {dimension_numbers = #tpu.dot_dimension_numbers<[1], [0], [0], [1], [0, 0, 1, 1], [], []>} : vector<1x32xf32>, vector<32x128xf32>, vector<1x128xf32> -> vector<1x128xf32>
    %15 = arith.addf %13, %14 : vector<1x128xf32>
    %16 = math.tanh %15 : vector<1x128xf32>
    %17 = vector.extract_strided_slice %16 {offsets = [0, 0], sizes = [1, 32], strides = [1, 1]} : vector<1x128xf32> to vector<1x32xf32>
    %cst_16 = arith.constant 5.000000e-01 : f32
    %18 = vector.broadcast %cst_16 : f32 to vector<1x32xf32>
    %19 = arith.mulf %18, %17 : vector<1x32xf32>
    %cst_17 = arith.constant 5.000000e-01 : f32
    %20 = vector.broadcast %cst_17 : f32 to vector<1x32xf32>
    %21 = arith.addf %19, %20 : vector<1x32xf32>
    %22 = vector.extract_strided_slice %16 {offsets = [0, 32], sizes = [1, 32], strides = [1, 1]} : vector<1x128xf32> to vector<1x32xf32>
    %cst_18 = arith.constant 5.000000e-01 : f32
    %23 = vector.broadcast %cst_18 : f32 to vector<1x32xf32>
    %24 = arith.mulf %23, %22 : vector<1x32xf32>
    %cst_19 = arith.constant 5.000000e-01 : f32
    %25 = vector.broadcast %cst_19 : f32 to vector<1x32xf32>
    %26 = arith.addf %24, %25 : vector<1x32xf32>
    %27 = vector.extract_strided_slice %16 {offsets = [0, 64], sizes = [1, 32], strides = [1, 1]} : vector<1x128xf32> to vector<1x32xf32>
    %28 = vector.extract_strided_slice %16 {offsets = [0, 96], sizes = [1, 32], strides = [1, 1]} : vector<1x128xf32> to vector<1x32xf32>
    %cst_20 = arith.constant 5.000000e-01 : f32
    %29 = vector.broadcast %cst_20 : f32 to vector<1x32xf32>
    %30 = arith.mulf %29, %28 : vector<1x32xf32>
    %cst_21 = arith.constant 5.000000e-01 : f32
    %31 = vector.broadcast %cst_21 : f32 to vector<1x32xf32>
    %32 = arith.addf %30, %31 : vector<1x32xf32>
    %33 = arith.mulf %26, %11 : vector<1x32xf32>
    %34 = arith.mulf %21, %27 : vector<1x32xf32>
    %35 = arith.addf %33, %34 : vector<1x32xf32>
    %36 = math.tanh %35 : vector<1x32xf32>
    %37 = arith.mulf %32, %36 : vector<1x32xf32>
    %38 = arith.index_cast %c0_i32 : i32 to index
    %c0_22 = arith.constant 0 : index
    %39 = vector.load %arg8[%38, %c0_22] : memref<8x32xf32, #tpu.memory_space<vmem>>, vector<1x32xf32>
    tpu.vector_store %arg8[%38, %c0_22], %37 {strides = array<i32>} : memref<8x32xf32, #tpu.memory_space<vmem>>, vector<1x32xf32>,
    %c1_i32 = arith.constant 1 : i32
    %40 = arith.index_cast %c1_i32 : i32 to index
    %c0_23 = arith.constant 0 : index
    %41 = vector.load %arg7[%40, %c0_23] : memref<8x128xf32, #tpu.memory_space<vmem>>, vector<1x128xf32>
    %cst_24 = arith.constant dense<0.000000e+00> : vector<1x128xf32>
    %42 = tpu.matmul %37, %9, %cst_24 {dimension_numbers = #tpu.dot_dimension_numbers<[1], [0], [0], [1], [0, 0, 1, 1], [], []>} : vector<1x32xf32>, vector<32x128xf32>, vector<1x128xf32> -> vector<1x128xf32>
    %43 = arith.addf %41, %42 : vector<1x128xf32>
    %44 = math.tanh %43 : vector<1x128xf32>
    %45 = vector.extract_strided_slice %44 {offsets = [0, 0], sizes = [1, 32], strides = [1, 1]} : vector<1x128xf32> to vector<1x32xf32>
    %cst_25 = arith.constant 5.000000e-01 : f32
    %46 = vector.broadcast %cst_25 : f32 to vector<1x32xf32>
    %47 = arith.mulf %46, %45 : vector<1x32xf32>
    %cst_26 = arith.constant 5.000000e-01 : f32
    %48 = vector.broadcast %cst_26 : f32 to vector<1x32xf32>
    %49 = arith.addf %47, %48 : vector<1x32xf32>
    %50 = vector.extract_strided_slice %44 {offsets = [0, 32], sizes = [1, 32], strides = [1, 1]} : vector<1x128xf32> to vector<1x32xf32>
    %cst_27 = arith.constant 5.000000e-01 : f32
    %51 = vector.broadcast %cst_27 : f32 to vector<1x32xf32>
    %52 = arith.mulf %51, %50 : vector<1x32xf32>
    %cst_28 = arith.constant 5.000000e-01 : f32
    %53 = vector.broadcast %cst_28 : f32 to vector<1x32xf32>
    %54 = arith.addf %52, %53 : vector<1x32xf32>
    %55 = vector.extract_strided_slice %44 {offsets = [0, 64], sizes = [1, 32], strides = [1, 1]} : vector<1x128xf32> to vector<1x32xf32>
    %56 = vector.extract_strided_slice %44 {offsets = [0, 96], sizes = [1, 32], strides = [1, 1]} : vector<1x128xf32> to vector<1x32xf32>
    %cst_29 = arith.constant 5.000000e-01 : f32
    %57 = vector.broadcast %cst_29 : f32 to vector<1x32xf32>
    %58 = arith.mulf %57, %56 : vector<1x32xf32>
    %cst_30 = arith.constant 5.000000e-01 : f32
    %59 = vector.broadcast %cst_30 : f32 to vector<1x32xf32>
    %60 = arith.addf %58, %59 : vector<1x32xf32>
    %61 = arith.mulf %54, %35 : vector<1x32xf32>
    %62 = arith.mulf %49, %55 : vector<1x32xf32>
    %63 = arith.addf %61, %62 : vector<1x32xf32>
    %64 = math.tanh %63 : vector<1x32xf32>
    %65 = arith.mulf %60, %64 : vector<1x32xf32>
    %66 = arith.index_cast %c1_i32 : i32 to index
    %c0_31 = arith.constant 0 : index
    %67 = vector.load %arg8[%66, %c0_31] : memref<8x32xf32, #tpu.memory_space<vmem>>, vector<1x32xf32>
    tpu.vector_store %arg8[%66, %c0_31], %65 {strides = array<i32>} : memref<8x32xf32, #tpu.memory_space<vmem>>, vector<1x32xf32>,
    %c2_i32 = arith.constant 2 : i32
    %68 = arith.index_cast %c2_i32 : i32 to index
    %c0_32 = arith.constant 0 : index
    %69 = vector.load %arg7[%68, %c0_32] : memref<8x128xf32, #tpu.memory_space<vmem>>, vector<1x128xf32>
    %cst_33 = arith.constant dense<0.000000e+00> : vector<1x128xf32>
    %70 = tpu.matmul %65, %9, %cst_33 {dimension_numbers = #tpu.dot_dimension_numbers<[1], [0], [0], [1], [0, 0, 1, 1], [], []>} : vector<1x32xf32>, vector<32x128xf32>, vector<1x128xf32> -> vector<1x128xf32>
    %71 = arith.addf %69, %70 : vector<1x128xf32>
    %72 = math.tanh %71 : vector<1x128xf32>
    %73 = vector.extract_strided_slice %72 {offsets = [0, 0], sizes = [1, 32], strides = [1, 1]} : vector<1x128xf32> to vector<1x32xf32>
    %cst_34 = arith.constant 5.000000e-01 : f32
    %74 = vector.broadcast %cst_34 : f32 to vector<1x32xf32>
    %75 = arith.mulf %74, %73 : vector<1x32xf32>
    %cst_35 = arith.constant 5.000000e-01 : f32
    %76 = vector.broadcast %cst_35 : f32 to vector<1x32xf32>
    %77 = arith.addf %75, %76 : vector<1x32xf32>
    %78 = vector.extract_strided_slice %72 {offsets = [0, 32], sizes = [1, 32], strides = [1, 1]} : vector<1x128xf32> to vector<1x32xf32>
    %cst_36 = arith.constant 5.000000e-01 : f32
    %79 = vector.broadcast %cst_36 : f32 to vector<1x32xf32>
    %80 = arith.mulf %79, %78 : vector<1x32xf32>
    %cst_37 = arith.constant 5.000000e-01 : f32
    %81 = vector.broadcast %cst_37 : f32 to vector<1x32xf32>
    %82 = arith.addf %80, %81 : vector<1x32xf32>
    %83 = vector.extract_strided_slice %72 {offsets = [0, 64], sizes = [1, 32], strides = [1, 1]} : vector<1x128xf32> to vector<1x32xf32>
    %84 = vector.extract_strided_slice %72 {offsets = [0, 96], sizes = [1, 32], strides = [1, 1]} : vector<1x128xf32> to vector<1x32xf32>
    %cst_38 = arith.constant 5.000000e-01 : f32
    %85 = vector.broadcast %cst_38 : f32 to vector<1x32xf32>
    %86 = arith.mulf %85, %84 : vector<1x32xf32>
    %cst_39 = arith.constant 5.000000e-01 : f32
    %87 = vector.broadcast %cst_39 : f32 to vector<1x32xf32>
    %88 = arith.addf %86, %87 : vector<1x32xf32>
    %89 = arith.mulf %82, %63 : vector<1x32xf32>
    %90 = arith.mulf %77, %83 : vector<1x32xf32>
    %91 = arith.addf %89, %90 : vector<1x32xf32>
    %92 = math.tanh %91 : vector<1x32xf32>
    %93 = arith.mulf %88, %92 : vector<1x32xf32>
    %94 = arith.index_cast %c2_i32 : i32 to index
    %c0_40 = arith.constant 0 : index
    %95 = vector.load %arg8[%94, %c0_40] : memref<8x32xf32, #tpu.memory_space<vmem>>, vector<1x32xf32>
    tpu.vector_store %arg8[%94, %c0_40], %93 {strides = array<i32>} : memref<8x32xf32, #tpu.memory_space<vmem>>, vector<1x32xf32>,
    %c3_i32 = arith.constant 3 : i32
    %96 = arith.index_cast %c3_i32 : i32 to index
    %c0_41 = arith.constant 0 : index
    %97 = vector.load %arg7[%96, %c0_41] : memref<8x128xf32, #tpu.memory_space<vmem>>, vector<1x128xf32>
    %cst_42 = arith.constant dense<0.000000e+00> : vector<1x128xf32>
    %98 = tpu.matmul %93, %9, %cst_42 {dimension_numbers = #tpu.dot_dimension_numbers<[1], [0], [0], [1], [0, 0, 1, 1], [], []>} : vector<1x32xf32>, vector<32x128xf32>, vector<1x128xf32> -> vector<1x128xf32>
    %99 = arith.addf %97, %98 : vector<1x128xf32>
    %100 = math.tanh %99 : vector<1x128xf32>
    %101 = vector.extract_strided_slice %100 {offsets = [0, 0], sizes = [1, 32], strides = [1, 1]} : vector<1x128xf32> to vector<1x32xf32>
    %cst_43 = arith.constant 5.000000e-01 : f32
    %102 = vector.broadcast %cst_43 : f32 to vector<1x32xf32>
    %103 = arith.mulf %102, %101 : vector<1x32xf32>
    %cst_44 = arith.constant 5.000000e-01 : f32
    %104 = vector.broadcast %cst_44 : f32 to vector<1x32xf32>
    %105 = arith.addf %103, %104 : vector<1x32xf32>
    %106 = vector.extract_strided_slice %100 {offsets = [0, 32], sizes = [1, 32], strides = [1, 1]} : vector<1x128xf32> to vector<1x32xf32>
    %cst_45 = arith.constant 5.000000e-01 : f32
    %107 = vector.broadcast %cst_45 : f32 to vector<1x32xf32>
    %108 = arith.mulf %107, %106 : vector<1x32xf32>
    %cst_46 = arith.constant 5.000000e-01 : f32
    %109 = vector.broadcast %cst_46 : f32 to vector<1x32xf32>
    %110 = arith.addf %108, %109 : vector<1x32xf32>
    %111 = vector.extract_strided_slice %100 {offsets = [0, 64], sizes = [1, 32], strides = [1, 1]} : vector<1x128xf32> to vector<1x32xf32>
    %112 = vector.extract_strided_slice %100 {offsets = [0, 96], sizes = [1, 32], strides = [1, 1]} : vector<1x128xf32> to vector<1x32xf32>
    %cst_47 = arith.constant 5.000000e-01 : f32
    %113 = vector.broadcast %cst_47 : f32 to vector<1x32xf32>
    %114 = arith.mulf %113, %112 : vector<1x32xf32>
    %cst_48 = arith.constant 5.000000e-01 : f32
    %115 = vector.broadcast %cst_48 : f32 to vector<1x32xf32>
    %116 = arith.addf %114, %115 : vector<1x32xf32>
    %117 = arith.mulf %110, %91 : vector<1x32xf32>
    %118 = arith.mulf %105, %111 : vector<1x32xf32>
    %119 = arith.addf %117, %118 : vector<1x32xf32>
    %120 = math.tanh %119 : vector<1x32xf32>
    %121 = arith.mulf %116, %120 : vector<1x32xf32>
    %122 = arith.index_cast %c3_i32 : i32 to index
    %c0_49 = arith.constant 0 : index
    %123 = vector.load %arg8[%122, %c0_49] : memref<8x32xf32, #tpu.memory_space<vmem>>, vector<1x32xf32>
    tpu.vector_store %arg8[%122, %c0_49], %121 {strides = array<i32>} : memref<8x32xf32, #tpu.memory_space<vmem>>, vector<1x32xf32>,
    %c4_i32 = arith.constant 4 : i32
    %124 = arith.index_cast %c4_i32 : i32 to index
    %c0_50 = arith.constant 0 : index
    %125 = vector.load %arg7[%124, %c0_50] : memref<8x128xf32, #tpu.memory_space<vmem>>, vector<1x128xf32>
    %cst_51 = arith.constant dense<0.000000e+00> : vector<1x128xf32>
    %126 = tpu.matmul %121, %9, %cst_51 {dimension_numbers = #tpu.dot_dimension_numbers<[1], [0], [0], [1], [0, 0, 1, 1], [], []>} : vector<1x32xf32>, vector<32x128xf32>, vector<1x128xf32> -> vector<1x128xf32>
    %127 = arith.addf %125, %126 : vector<1x128xf32>
    %128 = math.tanh %127 : vector<1x128xf32>
    %129 = vector.extract_strided_slice %128 {offsets = [0, 0], sizes = [1, 32], strides = [1, 1]} : vector<1x128xf32> to vector<1x32xf32>
    %cst_52 = arith.constant 5.000000e-01 : f32
    %130 = vector.broadcast %cst_52 : f32 to vector<1x32xf32>
    %131 = arith.mulf %130, %129 : vector<1x32xf32>
    %cst_53 = arith.constant 5.000000e-01 : f32
    %132 = vector.broadcast %cst_53 : f32 to vector<1x32xf32>
    %133 = arith.addf %131, %132 : vector<1x32xf32>
    %134 = vector.extract_strided_slice %128 {offsets = [0, 32], sizes = [1, 32], strides = [1, 1]} : vector<1x128xf32> to vector<1x32xf32>
    %cst_54 = arith.constant 5.000000e-01 : f32
    %135 = vector.broadcast %cst_54 : f32 to vector<1x32xf32>
    %136 = arith.mulf %135, %134 : vector<1x32xf32>
    %cst_55 = arith.constant 5.000000e-01 : f32
    %137 = vector.broadcast %cst_55 : f32 to vector<1x32xf32>
    %138 = arith.addf %136, %137 : vector<1x32xf32>
    %139 = vector.extract_strided_slice %128 {offsets = [0, 64], sizes = [1, 32], strides = [1, 1]} : vector<1x128xf32> to vector<1x32xf32>
    %140 = vector.extract_strided_slice %128 {offsets = [0, 96], sizes = [1, 32], strides = [1, 1]} : vector<1x128xf32> to vector<1x32xf32>
    %cst_56 = arith.constant 5.000000e-01 : f32
    %141 = vector.broadcast %cst_56 : f32 to vector<1x32xf32>
    %142 = arith.mulf %141, %140 : vector<1x32xf32>
    %cst_57 = arith.constant 5.000000e-01 : f32
    %143 = vector.broadcast %cst_57 : f32 to vector<1x32xf32>
    %144 = arith.addf %142, %143 : vector<1x32xf32>
    %145 = arith.mulf %138, %119 : vector<1x32xf32>
    %146 = arith.mulf %133, %139 : vector<1x32xf32>
    %147 = arith.addf %145, %146 : vector<1x32xf32>
    %148 = math.tanh %147 : vector<1x32xf32>
    %149 = arith.mulf %144, %148 : vector<1x32xf32>
    %150 = arith.index_cast %c4_i32 : i32 to index
    %c0_58 = arith.constant 0 : index
    %151 = vector.load %arg8[%150, %c0_58] : memref<8x32xf32, #tpu.memory_space<vmem>>, vector<1x32xf32>
    tpu.vector_store %arg8[%150, %c0_58], %149 {strides = array<i32>} : memref<8x32xf32, #tpu.memory_space<vmem>>, vector<1x32xf32>,
    %c5_i32 = arith.constant 5 : i32
    %152 = arith.index_cast %c5_i32 : i32 to index
    %c0_59 = arith.constant 0 : index
    %153 = vector.load %arg7[%152, %c0_59] : memref<8x128xf32, #tpu.memory_space<vmem>>, vector<1x128xf32>
    %cst_60 = arith.constant dense<0.000000e+00> : vector<1x128xf32>
    %154 = tpu.matmul %149, %9, %cst_60 {dimension_numbers = #tpu.dot_dimension_numbers<[1], [0], [0], [1], [0, 0, 1, 1], [], []>} : vector<1x32xf32>, vector<32x128xf32>, vector<1x128xf32> -> vector<1x128xf32>
    %155 = arith.addf %153, %154 : vector<1x128xf32>
    %156 = math.tanh %155 : vector<1x128xf32>
    %157 = vector.extract_strided_slice %156 {offsets = [0, 0], sizes = [1, 32], strides = [1, 1]} : vector<1x128xf32> to vector<1x32xf32>
    %cst_61 = arith.constant 5.000000e-01 : f32
    %158 = vector.broadcast %cst_61 : f32 to vector<1x32xf32>
    %159 = arith.mulf %158, %157 : vector<1x32xf32>
    %cst_62 = arith.constant 5.000000e-01 : f32
    %160 = vector.broadcast %cst_62 : f32 to vector<1x32xf32>
    %161 = arith.addf %159, %160 : vector<1x32xf32>
    %162 = vector.extract_strided_slice %156 {offsets = [0, 32], sizes = [1, 32], strides = [1, 1]} : vector<1x128xf32> to vector<1x32xf32>
    %cst_63 = arith.constant 5.000000e-01 : f32
    %163 = vector.broadcast %cst_63 : f32 to vector<1x32xf32>
    %164 = arith.mulf %163, %162 : vector<1x32xf32>
    %cst_64 = arith.constant 5.000000e-01 : f32
    %165 = vector.broadcast %cst_64 : f32 to vector<1x32xf32>
    %166 = arith.addf %164, %165 : vector<1x32xf32>
    %167 = vector.extract_strided_slice %156 {offsets = [0, 64], sizes = [1, 32], strides = [1, 1]} : vector<1x128xf32> to vector<1x32xf32>
    %168 = vector.extract_strided_slice %156 {offsets = [0, 96], sizes = [1, 32], strides = [1, 1]} : vector<1x128xf32> to vector<1x32xf32>
    %cst_65 = arith.constant 5.000000e-01 : f32
    %169 = vector.broadcast %cst_65 : f32 to vector<1x32xf32>
    %170 = arith.mulf %169, %168 : vector<1x32xf32>
    %cst_66 = arith.constant 5.000000e-01 : f32
    %171 = vector.broadcast %cst_66 : f32 to vector<1x32xf32>
    %172 = arith.addf %170, %171 : vector<1x32xf32>
    %173 = arith.mulf %166, %147 : vector<1x32xf32>
    %174 = arith.mulf %161, %167 : vector<1x32xf32>
    %175 = arith.addf %173, %174 : vector<1x32xf32>
    %176 = math.tanh %175 : vector<1x32xf32>
    %177 = arith.mulf %172, %176 : vector<1x32xf32>
    %178 = arith.index_cast %c5_i32 : i32 to index
    %c0_67 = arith.constant 0 : index
    %179 = vector.load %arg8[%178, %c0_67] : memref<8x32xf32, #tpu.memory_space<vmem>>, vector<1x32xf32>
    tpu.vector_store %arg8[%178, %c0_67], %177 {strides = array<i32>} : memref<8x32xf32, #tpu.memory_space<vmem>>, vector<1x32xf32>,
    %c6_i32 = arith.constant 6 : i32
    %180 = arith.index_cast %c6_i32 : i32 to index
    %c0_68 = arith.constant 0 : index
    %181 = vector.load %arg7[%180, %c0_68] : memref<8x128xf32, #tpu.memory_space<vmem>>, vector<1x128xf32>
    %cst_69 = arith.constant dense<0.000000e+00> : vector<1x128xf32>
    %182 = tpu.matmul %177, %9, %cst_69 {dimension_numbers = #tpu.dot_dimension_numbers<[1], [0], [0], [1], [0, 0, 1, 1], [], []>} : vector<1x32xf32>, vector<32x128xf32>, vector<1x128xf32> -> vector<1x128xf32>
    %183 = arith.addf %181, %182 : vector<1x128xf32>
    %184 = math.tanh %183 : vector<1x128xf32>
    %185 = vector.extract_strided_slice %184 {offsets = [0, 0], sizes = [1, 32], strides = [1, 1]} : vector<1x128xf32> to vector<1x32xf32>
    %cst_70 = arith.constant 5.000000e-01 : f32
    %186 = vector.broadcast %cst_70 : f32 to vector<1x32xf32>
    %187 = arith.mulf %186, %185 : vector<1x32xf32>
    %cst_71 = arith.constant 5.000000e-01 : f32
    %188 = vector.broadcast %cst_71 : f32 to vector<1x32xf32>
    %189 = arith.addf %187, %188 : vector<1x32xf32>
    %190 = vector.extract_strided_slice %184 {offsets = [0, 32], sizes = [1, 32], strides = [1, 1]} : vector<1x128xf32> to vector<1x32xf32>
    %cst_72 = arith.constant 5.000000e-01 : f32
    %191 = vector.broadcast %cst_72 : f32 to vector<1x32xf32>
    %192 = arith.mulf %191, %190 : vector<1x32xf32>
    %cst_73 = arith.constant 5.000000e-01 : f32
    %193 = vector.broadcast %cst_73 : f32 to vector<1x32xf32>
    %194 = arith.addf %192, %193 : vector<1x32xf32>
    %195 = vector.extract_strided_slice %184 {offsets = [0, 64], sizes = [1, 32], strides = [1, 1]} : vector<1x128xf32> to vector<1x32xf32>
    %196 = vector.extract_strided_slice %184 {offsets = [0, 96], sizes = [1, 32], strides = [1, 1]} : vector<1x128xf32> to vector<1x32xf32>
    %cst_74 = arith.constant 5.000000e-01 : f32
    %197 = vector.broadcast %cst_74 : f32 to vector<1x32xf32>
    %198 = arith.mulf %197, %196 : vector<1x32xf32>
    %cst_75 = arith.constant 5.000000e-01 : f32
    %199 = vector.broadcast %cst_75 : f32 to vector<1x32xf32>
    %200 = arith.addf %198, %199 : vector<1x32xf32>
    %201 = arith.mulf %194, %175 : vector<1x32xf32>
    %202 = arith.mulf %189, %195 : vector<1x32xf32>
    %203 = arith.addf %201, %202 : vector<1x32xf32>
    %204 = math.tanh %203 : vector<1x32xf32>
    %205 = arith.mulf %200, %204 : vector<1x32xf32>
    %206 = arith.index_cast %c6_i32 : i32 to index
    %c0_76 = arith.constant 0 : index
    %207 = vector.load %arg8[%206, %c0_76] : memref<8x32xf32, #tpu.memory_space<vmem>>, vector<1x32xf32>
    tpu.vector_store %arg8[%206, %c0_76], %205 {strides = array<i32>} : memref<8x32xf32, #tpu.memory_space<vmem>>, vector<1x32xf32>,
    %c7_i32 = arith.constant 7 : i32
    %208 = arith.index_cast %c7_i32 : i32 to index
    %c0_77 = arith.constant 0 : index
    %209 = vector.load %arg7[%208, %c0_77] : memref<8x128xf32, #tpu.memory_space<vmem>>, vector<1x128xf32>
    %cst_78 = arith.constant dense<0.000000e+00> : vector<1x128xf32>
    %210 = tpu.matmul %205, %9, %cst_78 {dimension_numbers = #tpu.dot_dimension_numbers<[1], [0], [0], [1], [0, 0, 1, 1], [], []>} : vector<1x32xf32>, vector<32x128xf32>, vector<1x128xf32> -> vector<1x128xf32>
    %211 = arith.addf %209, %210 : vector<1x128xf32>
    %212 = math.tanh %211 : vector<1x128xf32>
    %213 = vector.extract_strided_slice %212 {offsets = [0, 0], sizes = [1, 32], strides = [1, 1]} : vector<1x128xf32> to vector<1x32xf32>
    %cst_79 = arith.constant 5.000000e-01 : f32
    %214 = vector.broadcast %cst_79 : f32 to vector<1x32xf32>
    %215 = arith.mulf %214, %213 : vector<1x32xf32>
    %cst_80 = arith.constant 5.000000e-01 : f32
    %216 = vector.broadcast %cst_80 : f32 to vector<1x32xf32>
    %217 = arith.addf %215, %216 : vector<1x32xf32>
    %218 = vector.extract_strided_slice %212 {offsets = [0, 32], sizes = [1, 32], strides = [1, 1]} : vector<1x128xf32> to vector<1x32xf32>
    %cst_81 = arith.constant 5.000000e-01 : f32
    %219 = vector.broadcast %cst_81 : f32 to vector<1x32xf32>
    %220 = arith.mulf %219, %218 : vector<1x32xf32>
    %cst_82 = arith.constant 5.000000e-01 : f32
    %221 = vector.broadcast %cst_82 : f32 to vector<1x32xf32>
    %222 = arith.addf %220, %221 : vector<1x32xf32>
    %223 = vector.extract_strided_slice %212 {offsets = [0, 64], sizes = [1, 32], strides = [1, 1]} : vector<1x128xf32> to vector<1x32xf32>
    %224 = vector.extract_strided_slice %212 {offsets = [0, 96], sizes = [1, 32], strides = [1, 1]} : vector<1x128xf32> to vector<1x32xf32>
    %cst_83 = arith.constant 5.000000e-01 : f32
    %225 = vector.broadcast %cst_83 : f32 to vector<1x32xf32>
    %226 = arith.mulf %225, %224 : vector<1x32xf32>
    %cst_84 = arith.constant 5.000000e-01 : f32
    %227 = vector.broadcast %cst_84 : f32 to vector<1x32xf32>
    %228 = arith.addf %226, %227 : vector<1x32xf32>
    %229 = arith.mulf %222, %203 : vector<1x32xf32>
    %230 = arith.mulf %217, %223 : vector<1x32xf32>
    %231 = arith.addf %229, %230 : vector<1x32xf32>
    %232 = math.tanh %231 : vector<1x32xf32>
    %233 = arith.mulf %228, %232 : vector<1x32xf32>
    %234 = arith.index_cast %c7_i32 : i32 to index
    %c0_85 = arith.constant 0 : index
    %235 = vector.load %arg8[%234, %c0_85] : memref<8x32xf32, #tpu.memory_space<vmem>>, vector<1x32xf32>
    tpu.vector_store %arg8[%234, %c0_85], %233 {strides = array<i32>} : memref<8x32xf32, #tpu.memory_space<vmem>>, vector<1x32xf32>,
    %c8_i32 = arith.constant 8 : i32
    %c0_86 = arith.constant 0 : index
    %c0_87 = arith.constant 0 : index
    %236 = vector.load %arg8[%c0_86, %c0_87] : memref<8x32xf32, #tpu.memory_space<vmem>>, vector<8x32xf32>
    %c0_88 = arith.constant 0 : index
    %c0_89 = arith.constant 0 : index
    %237 = vector.load %arg4[%c0_88, %c0_89] : memref<32x1xf32, #tpu.memory_space<vmem>>, vector<32x1xf32>
    %cst_90 = arith.constant dense<0.000000e+00> : vector<8x1xf32>
    %238 = tpu.matmul %236, %237, %cst_90 {dimension_numbers = #tpu.dot_dimension_numbers<[1], [0], [0], [1], [0, 0, 1, 1], [], []>} : vector<8x32xf32>, vector<32x1xf32>, vector<8x1xf32> -> vector<8x1xf32>
    %c0_91 = arith.constant 0 : index
    %c0_92 = arith.constant 0 : index
    %239 = vector.load %arg5[%c0_91, %c0_92] : memref<1x1xf32, #tpu.memory_space<vmem>>, vector<1x1xf32>
    %240 = vector.broadcast %239 : vector<1x1xf32> to vector<8x1xf32>
    %241 = arith.addf %238, %240 : vector<8x1xf32>
    %c0_93 = arith.constant 0 : index
    %c0_94 = arith.constant 0 : index
    %242 = vector.load %arg6[%c0_93, %c0_94] : memref<8x1xf32, #tpu.memory_space<vmem>>, vector<8x1xf32>
    tpu.vector_store %arg6[%c0_93, %c0_94], %241 {strides = array<i32>} : memref<8x1xf32, #tpu.memory_space<vmem>>, vector<8x1xf32>,
    return
  }
}

</mosaic_0001>

<bundles_post_ra>
// kernel: tpu_custom_call.1
= control target key start
LH: loop header
LB: loop body
LE: loop exit
PB: predicated region body
PF: predicated region fallthrough
CT: control target
= control target key end

     0   :  { %s1498_s0 = inlined_call_operand.hbm [shape: f32[8,8], index: 0, kind: input, shape index: {}]   ;;  %s1499_s1 = inlined_call_operand.hbm [shape: f32[8,128], index: 1, kind: input, shape index: {}]   ;;  %s1500_s2 = inlined_call_operand.vmem [shape: f32[32,128], index: 2, kind: input, shape index: {}]   ;;  %s1501_s3 = inlined_call_operand.vmem [shape: f32[1,128], index: 3, kind: input, shape index: {}]   ;;  %s1502_s4 = inlined_call_operand.vmem [shape: f32[32,1], index: 4, kind: input, shape index: {}]   ;;  %s1503_s5 = inlined_call_operand.<no memory space> [shape: f32[1,1], index: 5, kind: input, shape index: {}]   ;;  %s1504_s6 = inlined_call_operand.vmem [shape: f32[8,1], index: 6, kind: output, shape index: {}]  }
   0x1   :  { %v11_v0 = vstv %s1503_s5 }
   0x2   :  { %12 = vst [vmem:[#allocation4] sm:$0x1] %v11_v0 }
   0x3   :  { %13 = vsyncpa [#allocation6], 0 }
   0x4   :  { %14 = vsyncpa [#allocation8], 0  ;;  %s1270_s23 = smov [#allocation5]   ;;  %s1271_s25 = smov [#allocation7]  }
   0x5   :  { %s21_s24 = sshll.u32 %s1270_s23, 4  ;;  %s31_s26 = sshll.u32 %s1271_s25, 4  ;;  %s22_s24 = int_to_ptr.vmem [resolvable:$true] %s21_s24  ;;  %s32_s26 = int_to_ptr.vmem [resolvable:$true] %s31_s26 }
   0x6   :  { %s1234_s27 = scalar_lea.vmem %s22_s24, 128  ;;  %p1239_p1 = scmp.lt.s32.totalorder %s22_s24, %s22_s24 }
   0x7   :  { %p1235_p0 = scmp.ne.s32.totalorder %s22_s24, %s1234_s27  ;;  %p1240_p2 = scmp.lt.s32.totalorder %s1234_s27, %s1234_s27 }
   0x9   :  { %p1241_p3 = por %p1240_p2, %p1239_p1 }
   0xb   :  { %p1242_p4 = pnand %p1241_p3, %p1235_p0 }
   0xd   :  { %1245 = shalt.err (!%p1242_p4)
}
   0xe   :  { %24 = dma.hbm_to_vmem [thread:$0]  %s1498_s0, 128, %s22_s24, [#allocation6]  }
   0xf   :  { %s1254_s5 = scalar_lea.vmem %s32_s26, 128  ;;  %p1259_p6 = scmp.lt.s32.totalorder %s32_s26, %s32_s26 }
  0x10   :  { %p1255_p5 = scmp.ne.s32.totalorder %s32_s26, %s1254_s5  ;;  %p1260_p7 = scmp.lt.s32.totalorder %s1254_s5, %s1254_s5 }
  0x12   :  { %p1261_p8 = por %p1260_p7, %p1259_p6 }
  0x14   :  { %p1262_p9 = pnand %p1261_p8, %p1255_p5 }
  0x16   :  { %1265 = shalt.err (!%p1262_p9)
}
  0x17   :  { %34 = dma.hbm_to_vmem [thread:$0]  %s1499_s1, 128, %s32_s26, [#allocation8]  }
  0x18   :  { %1266 = dma.done.wait [#allocation6], 128  }
  0x19   :  { %1267 = vsyncadd [#allocation6], 4294967168 }
  0x1a   :  { %1268 = dma.done.wait [#allocation8], 128  }
  0x1b   :  { %1269 = vsyncadd [#allocation8], 4294967168  ;;  %v1272_v1 = vmov 0.0   ;;  %vm1273_vm0 = vmmov 0   ;;  %vm58_vm1 = vcmask 64512   ;;  %v50_v2 = vld [vmem:[#allocation7] sm:$0xff] }
  0x1c   :  { %1084 = vmatprep.subr.mxu0 %v1272_v1  ;;  %1086 = vmatprep.mubr.msk.f32.mxu0 %vm1273_vm0, %v1272_v1  ;;  %v49_v3 = vld [vmem:[#allocation5] sm:$0xff]  ;;  %v1341_v6 = vld [vmem:[%s1500_s2 + $0x8] sm:$0xff]  ;;  %v1349_v7 = vld [vmem:[%s1500_s2] sm:$0xff]  ;;  %s1274_s15 = smov 64   ;;  %s1275_s16 = smov 32   ;;  %vm133_vm2 = vcmask 261120  }
  0x1d   :  { %1089 = vmatprep.subr.mxu1 %v1272_v1  ;;  %1097 = vmatprep.mubr.msk.f32.mxu1 %vm1273_vm0, %v1272_v1  ;;  %v1329_v4 = vld [vmem:[%s1500_s2 + $0x18] sm:$0xff]  ;;  %v1335_v5 = vld [vmem:[%s1500_s2 + $0x10] sm:$0xff]  ;;  %v1026_v8 = vld [vmem:[%s1501_s3] ss:$0 sm:$0xff]  ;;  %134 = vst.msk [vmem:[#allocation3] sm:$0xff] %vm133_vm2, %v1272_v1  ;;  %vm238_vm3 = vcmask 253952  }
  0x1e   :  { %1085 = vmatpush3.msra.mxu0 %v50_v2  ;;  %1090 = vmatpush3.msra.mxu1 %v1329_v4  ;;  %vm1018_vm4 = vcmask 7168  }
  0x1f   :  { %1087 = vmatmul.mubr.msk.f32.vlgmr.msra.gmra.mxu0 %vm58_vm1, %v49_v3  ;;  %1091 = vmatprep.subr.mxu1 %v1272_v1 }
  0x20   :  { %1092 = vmatpush3.msra.mxu1 %v1335_v5  ;;  %1100 = vmatprep.subr.mxu0 %v1272_v1 }
  0x21   :  { %1093 = vmatprep.subr.mxu1 %v1272_v1  ;;  %1101 = vmatpush3.msra.mxu0 %v1329_v4 }
  0x22   :  { %1094 = vmatpush3.msra.mxu1 %v1341_v6  ;;  %1102 = vmatprep.subr.mxu0 %v1272_v1 }
  0x23   :  { %1095 = vmatprep.subr.mxu1 %v1272_v1  ;;  %1103 = vmatpush3.msra.mxu0 %v1335_v5 }
  0x24   :  { %1096 = vmatpush3.msra.mxu1 %v1349_v7  ;;  %1104 = vmatprep.subr.mxu0 %v1272_v1 }
  0x25   :  { %1098 = vmatmul.mubr.f32.vlgmr.msra.gmra.mxu1 %v1272_v1  ;;  %1105 = vmatpush3.msra.mxu0 %v1341_v6 }
  0x26   :  { %1106 = vmatprep.subr.mxu0 %v1272_v1  ;;  %1108 = vmatprep.mubr.msk.f32.mxu0 %vm1273_vm0, %v1272_v1 }
  0x27   :  { %1107 = vmatpush3.msra.mxu0 %v1349_v7  ;;  %1111 = vmatprep.subr.mxu1 %v1272_v1 }
  0x28   :  { %1112 = vmatpush3.msra.mxu1 %v1329_v4  ;;  %1119 = vmatprep.mubr.msk.f32.mxu1 %vm1273_vm0, %v1272_v1 }
  0x29   :  { %1113 = vmatprep.subr.mxu1 %v1272_v1  ;;  %1122 = vmatprep.subr.mxu0 %v1272_v1 }
  0x2a   :  { %1114 = vmatpush3.msra.mxu1 %v1335_v5 }
  0x2b   :  { %1115 = vmatprep.subr.mxu1 %v1272_v1 }
  0x2c   :  { %1116 = vmatpush3.msra.mxu1 %v1341_v6 }
  0x2d   :  { %1117 = vmatprep.subr.mxu1 %v1272_v1 }
  0x2e   :  { %1118 = vmatpush3.msra.mxu1 %v1349_v7 }
  0x2f   :  { %1133 = vmatprep.subr.mxu1 %v1272_v1 }
  0xdf   :  { %v128_v9 = vpop.f32.mrf.mxu0 }
  0xe0   :  { %v129_v10 = vadd.f32 %v1026_v8, %v128_v9 }
  0xe1   :  { %v1088_v11 = vpop.f32.mrf.mxu0 }
  0xe2   :  { %132 = vst [vmem:[#allocation2] sm:$0xff] %v129_v10 }
  0xe5   :  { %v209_v12 = vpop.f32.mrf.mxu1 }
  0xe7   :  { %v1099_v13 = vpop.f32.mrf.mxu1 }
  0xe9   :  { %v139_v14 = vld [vmem:[#allocation2] sm:$0x1]  ;;  %v240_v28 = vld [vmem:[#allocation2 + $0x1] sm:$0x1]  ;;  %v339_v44 = vld [vmem:[#allocation2 + $0x2] sm:$0x1] }
  0xea   :  { %v213_v15 = vadd.f32 %v209_v12, %v139_v14  ;;  %v438_v60 = vld [vmem:[#allocation2 + $0x3] sm:$0x1] }
  0xec   :  { %1194 = vtanh.f32 %v213_v15 }
  0xf9   :  { %v1195_v16 = vpop.eup %1194 }
  0xfa   :  { %219 = vrot.lane.b32.xlu0 %v1195_v16, %s1274_s15  ;;  %v215_v17 = vmul.f32 0.5, %v1195_v16 }
  0xfc   :  { %v216_v18 = vadd.f32 0.5, %v215_v17  ;;  %v537_v17 = vld [vmem:[#allocation2 + $0x4] sm:$0x1] }
  0xfe   :  { %v217_v21 = vmul.f32 0.0, %v216_v18 }
 0x16c   :  { %v220_v19 = vpop.permute.xlu0 %219 }
 0x16d   :  { %v222_v20 = vmul.f32 %v220_v19, %v216_v18 }
 0x16f   :  { %224 = vrot.lane.b32.xlu0 %v222_v20, %s1275_s16 }
 0x1e1   :  { %v225_v22 = vpop.permute.xlu0 %224 }
 0x1e2   :  { %v227_v23 = vadd.f32 %v225_v22, %v217_v21 }
 0x1e4   :  { %1196 = vtanh.f32 %v227_v23 }
 0x1f1   :  { %v1197_v24 = vpop.eup %1196 }
 0x1f2   :  { %230 = vrot.lane.b32.xlu1 %v1197_v24, %s1274_s15 }
 0x264   :  { %v231_v25 = vpop.permute.xlu1 %230 }
 0x265   :  { %v233_v26 = vmul.f32 %v231_v25, %v216_v18 }
 0x267   :  { %235 = vrot.lane.b32.xlu1 %v233_v26, %s1275_s16 }
 0x2d9   :  { %v236_v27 = vpop.permute.xlu1 %235 }
 0x2da   :  { %239 = vst.msk [vmem:[#allocation3] sm:$0x1] %vm238_vm3, %v236_v27  ;;  %1109 = vmatmul.mubr.msk.f32.vlgmr.msra.gmra.mxu0 %vm133_vm2, %v236_v27 }
 0x2db   :  { %1123 = vmatpush3.msra.mxu0 %v1329_v4  ;;  %1130 = vmatprep.mubr.msk.f32.mxu0 %vm1273_vm0, %v1272_v1 }
 0x2dc   :  { %1124 = vmatprep.subr.mxu0 %v1272_v1 }
 0x2dd   :  { %1125 = vmatpush3.msra.mxu0 %v1335_v5 }
 0x2de   :  { %1126 = vmatprep.subr.mxu0 %v1272_v1 }
 0x2df   :  { %1127 = vmatpush3.msra.mxu0 %v1341_v6 }
 0x2e0   :  { %1128 = vmatprep.subr.mxu0 %v1272_v1 }
 0x2e1   :  { %1129 = vmatpush3.msra.mxu0 %v1349_v7 }
 0x2e2   :  { %1144 = vmatprep.subr.mxu0 %v1272_v1 }
 0x39a   :  { %v309_v29 = vpop.f32.mrf.mxu0 }
 0x39b   :  { %v313_v30 = vadd.f32 %v309_v29, %v240_v28 }
 0x39c   :  { %v1110_v31 = vpop.f32.mrf.mxu0 }
 0x39d   :  { %1198 = vtanh.f32 %v313_v30 }
 0x3aa   :  { %v1199_v32 = vpop.eup %1198 }
 0x3ab   :  { %319 = vrot.lane.b32.xlu0 %v1199_v32, %s1274_s15  ;;  %v315_v33 = vmul.f32 0.5, %v1199_v32 }
 0x3ad   :  { %v316_v34 = vadd.f32 0.5, %v315_v33  ;;  %v636_v33 = vld [vmem:[#allocation2 + $0x5] sm:$0x1] }
 0x3af   :  { %v317_v37 = vmul.f32 %v316_v34, %v227_v23 }
 0x41d   :  { %v320_v35 = vpop.permute.xlu0 %319 }
 0x41e   :  { %v322_v36 = vmul.f32 %v320_v35, %v316_v34 }
 0x420   :  { %324 = vrot.lane.b32.xlu1 %v322_v36, %s1275_s16 }
 0x492   :  { %v325_v38 = vpop.permute.xlu1 %324 }
 0x493   :  { %v327_v39 = vadd.f32 %v325_v38, %v317_v37 }
 0x495   :  { %1200 = vtanh.f32 %v327_v39 }
 0x4a2   :  { %v1201_v40 = vpop.eup %1200 }
 0x4a3   :  { %330 = vrot.lane.b32.xlu0 %v1201_v40, %s1274_s15 }
 0x515   :  { %v331_v41 = vpop.permute.xlu0 %330 }
 0x516   :  { %v333_v42 = vmul.f32 %v331_v41, %v316_v34 }
 0x518   :  { %335 = vrot.lane.b32.xlu1 %v333_v42, %s1275_s16 }
 0x58a   :  { %v336_v43 = vpop.permute.xlu1 %335 }
 0x58b   :  { %338 = vst.msk [vmem:[#allocation3 + $0x1] sm:$0x1] %vm238_vm3, %v336_v43  ;;  %1120 = vmatmul.mubr.msk.f32.vlgmr.msra.gmra.mxu1 %vm133_vm2, %v336_v43 }
 0x58c   :  { %1134 = vmatpush3.msra.mxu1 %v1329_v4  ;;  %1141 = vmatprep.mubr.msk.f32.mxu1 %vm1273_vm0, %v1272_v1 }
 0x58d   :  { %1135 = vmatprep.subr.mxu1 %v1272_v1 }
 0x58e   :  { %1136 = vmatpush3.msra.mxu1 %v1335_v5 }
 0x58f   :  { %1137 = vmatprep.subr.mxu1 %v1272_v1 }
 0x590   :  { %1138 = vmatpush3.msra.mxu1 %v1341_v6 }
 0x591   :  { %1139 = vmatprep.subr.mxu1 %v1272_v1 }
 0x592   :  { %1140 = vmatpush3.msra.mxu1 %v1349_v7 }
 0x593   :  { %1155 = vmatprep.subr.mxu1 %v1272_v1 }
 0x64b   :  { %v408_v45 = vpop.f32.mrf.mxu1 }
 0x64c   :  { %v412_v46 = vadd.f32 %v408_v45, %v339_v44  ;;  %v735_v45 = vld [vmem:[#allocation2 + $0x6] sm:$0x1] }
 0x64d   :  { %v1121_v47 = vpop.f32.mrf.mxu1 }
 0x64e   :  { %1202 = vtanh.f32 %v412_v46 }
 0x65b   :  { %v1203_v48 = vpop.eup %1202 }
 0x65c   :  { %418 = vrot.lane.b32.xlu0 %v1203_v48, %s1274_s15  ;;  %v414_v49 = vmul.f32 0.5, %v1203_v48 }
 0x65e   :  { %v415_v50 = vadd.f32 0.5, %v414_v49 }
 0x660   :  { %v416_v53 = vmul.f32 %v415_v50, %v327_v39 }
 0x6ce   :  { %v419_v51 = vpop.permute.xlu0 %418 }
 0x6cf   :  { %v421_v52 = vmul.f32 %v419_v51, %v415_v50 }
 0x6d1   :  { %423 = vrot.lane.b32.xlu1 %v421_v52, %s1275_s16 }
 0x743   :  { %v424_v54 = vpop.permute.xlu1 %423 }
 0x744   :  { %v426_v55 = vadd.f32 %v424_v54, %v416_v53 }
 0x746   :  { %1204 = vtanh.f32 %v426_v55 }
 0x753   :  { %v1205_v56 = vpop.eup %1204 }
 0x754   :  { %429 = vrot.lane.b32.xlu0 %v1205_v56, %s1274_s15 }
 0x7c6   :  { %v430_v57 = vpop.permute.xlu0 %429 }
 0x7c7   :  { %v432_v58 = vmul.f32 %v430_v57, %v415_v50 }
 0x7c9   :  { %434 = vrot.lane.b32.xlu1 %v432_v58, %s1275_s16 }
 0x83b   :  { %v435_v59 = vpop.permute.xlu1 %434 }
 0x83c   :  { %437 = vst.msk [vmem:[#allocation3 + $0x2] sm:$0x1] %vm238_vm3, %v435_v59  ;;  %1131 = vmatmul.mubr.msk.f32.vlgmr.msra.gmra.mxu0 %vm133_vm2, %v435_v59 }
 0x83d   :  { %1145 = vmatpush3.msra.mxu0 %v1329_v4  ;;  %1152 = vmatprep.mubr.msk.f32.mxu0 %vm1273_vm0, %v1272_v1 }
 0x83e   :  { %1146 = vmatprep.subr.mxu0 %v1272_v1 }
 0x83f   :  { %1147 = vmatpush3.msra.mxu0 %v1335_v5 }
 0x840   :  { %1148 = vmatprep.subr.mxu0 %v1272_v1 }
 0x841   :  { %1149 = vmatpush3.msra.mxu0 %v1341_v6 }
 0x842   :  { %1150 = vmatprep.subr.mxu0 %v1272_v1 }
 0x843   :  { %1151 = vmatpush3.msra.mxu0 %v1349_v7 }
 0x844   :  { %1166 = vmatprep.subr.mxu0 %v1272_v1 }
 0x8fc   :  { %v507_v61 = vpop.f32.mrf.mxu0 }
 0x8fd   :  { %v511_v62 = vadd.f32 %v507_v61, %v438_v60  ;;  %v834_v61 = vld [vmem:[#allocation2 + $0x7] sm:$0x1] }
 0x8fe   :  { %v1132_v63 = vpop.f32.mrf.mxu0 }
 0x8ff   :  { %1206 = vtanh.f32 %v511_v62 }
 0x90c   :  { %v1207_v0 = vpop.eup %1206 }
 0x90d   :  { %517 = vrot.lane.b32.xlu0 %v1207_v0, %s1274_s15  ;;  %v513_v2 = vmul.f32 0.5, %v1207_v0 }
 0x90f   :  { %v514_v3 = vadd.f32 0.5, %v513_v2 }
 0x911   :  { %v515_v10 = vmul.f32 %v514_v3, %v426_v55 }
 0x97f   :  { %v518_v8 = vpop.permute.xlu0 %517 }
 0x980   :  { %v520_v9 = vmul.f32 %v518_v8, %v514_v3 }
 0x982   :  { %522 = vrot.lane.b32.xlu1 %v520_v9, %s1275_s16 }
 0x9f4   :  { %v523_v11 = vpop.permute.xlu1 %522 }
 0x9f5   :  { %v525_v12 = vadd.f32 %v523_v11, %v515_v10 }
 0x9f7   :  { %1208 = vtanh.f32 %v525_v12 }
 0xa04   :  { %v1209_v13 = vpop.eup %1208 }
 0xa05   :  { %528 = vrot.lane.b32.xlu0 %v1209_v13, %s1274_s15 }
 0xa77   :  { %v529_v14 = vpop.permute.xlu0 %528 }
 0xa78   :  { %v531_v15 = vmul.f32 %v529_v14, %v514_v3 }
 0xa7a   :  { %533 = vrot.lane.b32.xlu1 %v531_v15, %s1275_s16  ;;  %v937_v15 = vld [vmem:[%s1502_s4 + $0x18] sm:$0xff] }
 0xaec   :  { %v534_v16 = vpop.permute.xlu1 %533 }
 0xaed   :  { %536 = vst.msk [vmem:[#allocation3 + $0x3] sm:$0x1] %vm238_vm3, %v534_v16  ;;  %1142 = vmatmul.mubr.msk.f32.vlgmr.msra.gmra.mxu1 %vm133_vm2, %v534_v16  ;;  %v936_v16 = vld [vmem:[%s1502_s4 + $0x10] sm:$0xff] }
 0xaee   :  { %1156 = vmatpush3.msra.mxu1 %v1329_v4  ;;  %1163 = vmatprep.mubr.msk.f32.mxu1 %vm1273_vm0, %v1272_v1 }
 0xaef   :  { %1157 = vmatprep.subr.mxu1 %v1272_v1 }
 0xaf0   :  { %1158 = vmatpush3.msra.mxu1 %v1335_v5 }
 0xaf1   :  { %1159 = vmatprep.subr.mxu1 %v1272_v1 }
 0xaf2   :  { %1160 = vmatpush3.msra.mxu1 %v1341_v6 }
 0xaf3   :  { %1161 = vmatprep.subr.mxu1 %v1272_v1 }
 0xaf4   :  { %1162 = vmatpush3.msra.mxu1 %v1349_v7 }
 0xaf5   :  { %1177 = vmatprep.subr.mxu1 %v1272_v1 }
 0xbad   :  { %v606_v18 = vpop.f32.mrf.mxu1 }
 0xbae   :  { %v610_v19 = vadd.f32 %v606_v18, %v537_v17  ;;  %v935_v17 = vld [vmem:[%s1502_s4 + $0x8] sm:$0xff]  ;;  %v934_v18 = vld [vmem:[%s1502_s4] sm:$0xff] }
 0xbaf   :  { %v1143_v20 = vpop.f32.mrf.mxu1 }
 0xbb0   :  { %1210 = vtanh.f32 %v610_v19 }
 0xbbd   :  { %v1211_v21 = vpop.eup %1210 }
 0xbbe   :  { %616 = vrot.lane.b32.xlu0 %v1211_v21, %s1274_s15  ;;  %v612_v22 = vmul.f32 0.5, %v1211_v21 }
 0xbc0   :  { %v613_v23 = vadd.f32 0.5, %v612_v22 }
 0xbc2   :  { %v614_v26 = vmul.f32 %v613_v23, %v525_v12 }
 0xc30   :  { %v617_v24 = vpop.permute.xlu0 %616 }
 0xc31   :  { %v619_v25 = vmul.f32 %v617_v24, %v613_v23 }
 0xc33   :  { %621 = vrot.lane.b32.xlu1 %v619_v25, %s1275_s16 }
 0xca5   :  { %v622_v27 = vpop.permute.xlu1 %621 }
 0xca6   :  { %v624_v28 = vadd.f32 %v622_v27, %v614_v26 }
 0xca8   :  { %1212 = vtanh.f32 %v624_v28 }
 0xcb5   :  { %v1213_v29 = vpop.eup %1212 }
 0xcb6   :  { %627 = vrot.lane.b32.xlu0 %v1213_v29, %s1274_s15 }
 0xd28   :  { %v628_v30 = vpop.permute.xlu0 %627 }
 0xd29   :  { %v630_v31 = vmul.f32 %v628_v30, %v613_v23  ;;  %v1035_v23 = vld [vmem:[#allocation4] ss:$0 sm:$0xff] }
 0xd2b   :  { %632 = vrot.lane.b32.xlu1 %v630_v31, %s1275_s16 }
 0xd9d   :  { %v633_v32 = vpop.permute.xlu1 %632 }
 0xd9e   :  { %635 = vst.msk [vmem:[#allocation3 + $0x4] sm:$0x1] %vm238_vm3, %v633_v32  ;;  %1153 = vmatmul.mubr.msk.f32.vlgmr.msra.gmra.mxu0 %vm133_vm2, %v633_v32 }
 0xd9f   :  { %1167 = vmatpush3.msra.mxu0 %v1329_v4  ;;  %1174 = vmatprep.mubr.msk.f32.mxu0 %vm1273_vm0, %v1272_v1 }
 0xda0   :  { %1168 = vmatprep.subr.mxu0 %v1272_v1 }
 0xda1   :  { %1169 = vmatpush3.msra.mxu0 %v1335_v5 }
 0xda2   :  { %1170 = vmatprep.subr.mxu0 %v1272_v1 }
 0xda3   :  { %1171 = vmatpush3.msra.mxu0 %v1341_v6 }
 0xda4   :  { %1172 = vmatprep.subr.mxu0 %v1272_v1 }
 0xda5   :  { %1173 = vmatpush3.msra.mxu0 %v1349_v7 }
 0xe5e   :  { %v705_v34 = vpop.f32.mrf.mxu0 }
 0xe5f   :  { %v709_v35 = vadd.f32 %v705_v34, %v636_v33 }
 0xe60   :  { %v1154_v36 = vpop.f32.mrf.mxu0 }
 0xe61   :  { %1214 = vtanh.f32 %v709_v35 }
 0xe6e   :  { %v1215_v4 = vpop.eup %1214 }
 0xe6f   :  { %715 = vrot.lane.b32.xlu0 %v1215_v4, %s1274_s15  ;;  %v711_v37 = vmul.f32 0.5, %v1215_v4 }
 0xe71   :  { %v712_v38 = vadd.f32 0.5, %v711_v37 }
 0xe73   :  { %v713_v40 = vmul.f32 %v712_v38, %v624_v28 }
 0xee1   :  { %v716_v39 = vpop.permute.xlu0 %715 }
 0xee2   :  { %v718_v5 = vmul.f32 %v716_v39, %v712_v38 }
 0xee4   :  { %720 = vrot.lane.b32.xlu1 %v718_v5, %s1275_s16 }
 0xf56   :  { %v721_v6 = vpop.permute.xlu1 %720 }
 0xf57   :  { %v723_v41 = vadd.f32 %v721_v6, %v713_v40 }
 0xf59   :  { %1216 = vtanh.f32 %v723_v41 }
 0xf66   :  { %v1217_v42 = vpop.eup %1216 }
 0xf67   :  { %726 = vrot.lane.b32.xlu0 %v1217_v42, %s1274_s15 }
 0xfd9   :  { %v727_v7 = vpop.permute.xlu0 %726 }
 0xfda   :  { %v729_v43 = vmul.f32 %v727_v7, %v712_v38 }
 0xfdc   :  { %731 = vrot.lane.b32.xlu1 %v729_v43, %s1275_s16 }
0x104e   :  { %v732_v44 = vpop.permute.xlu1 %731 }
0x104f   :  { %734 = vst.msk [vmem:[#allocation3 + $0x5] sm:$0x1] %vm238_vm3, %v732_v44  ;;  %1164 = vmatmul.mubr.msk.f32.vlgmr.msra.gmra.mxu1 %vm133_vm2, %v732_v44 }
0x1050   :  { %1185 = vmatprep.mubr.msk.f32.mxu1 %vm1273_vm0, %v1272_v1  ;;  %1178 = vmatpush3.msra.mxu1 %v937_v15 }
0x1051   :  { %1179 = vmatprep.subr.mxu1 %v1272_v1 }
0x1052   :  { %1180 = vmatpush3.msra.mxu1 %v936_v16 }
0x1053   :  { %1181 = vmatprep.subr.mxu1 %v1272_v1 }
0x1054   :  { %1182 = vmatpush3.msra.mxu1 %v935_v17 }
0x1055   :  { %1183 = vmatprep.subr.mxu1 %v1272_v1 }
0x1056   :  { %1184 = vmatpush3.msra.mxu1 %v934_v18 }
0x110f   :  { %v804_v46 = vpop.f32.mrf.mxu1 }
0x1110   :  { %v808_v47 = vadd.f32 %v804_v46, %v735_v45 }
0x1111   :  { %v1165_v48 = vpop.f32.mrf.mxu1 }
0x1112   :  { %1218 = vtanh.f32 %v808_v47 }
0x111f   :  { %v1219_v49 = vpop.eup %1218 }
0x1120   :  { %814 = vrot.lane.b32.xlu0 %v1219_v49, %s1274_s15  ;;  %v810_v50 = vmul.f32 0.5, %v1219_v49 }
0x1122   :  { %v811_v51 = vadd.f32 0.5, %v810_v50 }
0x1124   :  { %v812_v54 = vmul.f32 %v811_v51, %v723_v41 }
0x1192   :  { %v815_v52 = vpop.permute.xlu0 %814 }
0x1193   :  { %v817_v53 = vmul.f32 %v815_v52, %v811_v51 }
0x1195   :  { %819 = vrot.lane.b32.xlu1 %v817_v53, %s1275_s16 }
0x1207   :  { %v820_v55 = vpop.permute.xlu1 %819 }
0x1208   :  { %v822_v56 = vadd.f32 %v820_v55, %v812_v54 }
0x120a   :  { %1220 = vtanh.f32 %v822_v56 }
0x1217   :  { %v1221_v57 = vpop.eup %1220 }
0x1218   :  { %825 = vrot.lane.b32.xlu0 %v1221_v57, %s1274_s15 }
0x128a   :  { %v826_v58 = vpop.permute.xlu0 %825 }
0x128b   :  { %v828_v59 = vmul.f32 %v826_v58, %v811_v51 }
0x128d   :  { %830 = vrot.lane.b32.xlu1 %v828_v59, %s1275_s16 }
0x12ff   :  { %v831_v60 = vpop.permute.xlu1 %830 }
0x1300   :  { %833 = vst.msk [vmem:[#allocation3 + $0x6] sm:$0x1] %vm238_vm3, %v831_v60  ;;  %1175 = vmatmul.mubr.msk.f32.vlgmr.msra.gmra.mxu0 %vm133_vm2, %v831_v60 }
0x13c0   :  { %v903_v62 = vpop.f32.mrf.mxu0 }
0x13c1   :  { %v907_v63 = vadd.f32 %v903_v62, %v834_v61 }
0x13c2   :  { %v1176_v0 = vpop.f32.mrf.mxu0 }
0x13c3   :  { %1222 = vtanh.f32 %v907_v63 }
0x13d0   :  { %v1223_v2 = vpop.eup %1222 }
0x13d1   :  { %913 = vrot.lane.b32.xlu0 %v1223_v2, %s1274_s15  ;;  %v909_v3 = vmul.f32 0.5, %v1223_v2 }
0x13d3   :  { %v910_v8 = vadd.f32 0.5, %v909_v3 }
0x13d5   :  { %v911_v11 = vmul.f32 %v910_v8, %v822_v56 }
0x1443   :  { %v914_v9 = vpop.permute.xlu0 %913 }
0x1444   :  { %v916_v10 = vmul.f32 %v914_v9, %v910_v8 }
0x1446   :  { %918 = vrot.lane.b32.xlu1 %v916_v10, %s1275_s16 }
0x14b8   :  { %v919_v12 = vpop.permute.xlu1 %918 }
0x14b9   :  { %v921_v13 = vadd.f32 %v919_v12, %v911_v11 }
0x14bb   :  { %1224 = vtanh.f32 %v921_v13 }
0x14c8   :  { %v1225_v14 = vpop.eup %1224 }
0x14c9   :  { %924 = vrot.lane.b32.xlu0 %v1225_v14, %s1274_s15 }
0x153b   :  { %v925_v19 = vpop.permute.xlu0 %924 }
0x153c   :  { %v927_v20 = vmul.f32 %v925_v19, %v910_v8 }
0x153e   :  { %929 = vrot.lane.b32.xlu1 %v927_v20, %s1275_s16 }
0x15b0   :  { %v930_v21 = vpop.permute.xlu1 %929 }
0x15b1   :  { %932 = vst.msk [vmem:[#allocation3 + $0x7] sm:$0x1] %vm238_vm3, %v930_v21 }
0x15b8   :  { %v933_v22 = vld [vmem:[#allocation3] sm:$0xff] }
0x15b9   :  { %1186 = vmatmul.mubr.msk.f32.vlgmr.msra.gmra.mxu1 %vm133_vm2, %v933_v22 }
0x1679   :  { %v1014_v24 = vpop.f32.mrf.mxu1 }
0x167a   :  { %v1015_v25 = vadd.f32 %v1035_v23, %v1014_v24 }
0x167b   :  { %v1187_v26 = vpop.f32.mrf.mxu1 }
0x167c   :  { %1019 = vst.msk [vmem:[%s1504_s6] sm:$0xff] %vm1018_vm4, %v1015_v25 }
0x167d   :  { %1024 = vsyncpa [#allocation6], 1 }
0x167e   :  { %1025 = vsyncpa [#allocation8], 1 }

</bundles_post_ra>
